<compile_context>
chip_gen: v7x
topology: tpu7x:2x2x1
jax: 0.10.0
libtpu: 0.0.40
codegen_flags: <defaults>
</compile_context>

<pallas_src>
import functools
import math

import jax
import jax.numpy as jnp
from jax.experimental import pallas as pl
from jax.experimental.pallas import tpu as pltpu


def _round_up(x, m):
    return (x + m - 1) // m * m


def _autoencoder_kernel(x_ref,
                        w1_ref, b1_ref, w2_ref, b2_ref,   # encoder params
                        w3_ref, b3_ref, w4_ref, b4_ref,   # decoder params
                        z_ref, xt_ref):
    """Fused encoder + decoder MLP on one (TB, D) batch tile.

    Weights are bf16 and VMEM-resident (constant index_map); all matmuls
    accumulate in f32 on the MXU; biases, tanh and outputs stay f32.
    Note: the decoder consumes the bf16-rounded z (the returned z is f32);
    this is within the verified tolerance vs. the f32 reference.
    """
    x = x_ref[...].astype(jnp.bfloat16)                       # (TB, D)

    # ---- encoder: Linear -> Tanh -> Linear ----
    h = jnp.tanh(jnp.dot(x, w1_ref[...],
                         preferred_element_type=jnp.float32) + b1_ref[...])
    z = jnp.dot(h.astype(jnp.bfloat16), w2_ref[...],
                preferred_element_type=jnp.float32) + b2_ref[...]
    z_ref[...] = z.astype(z_ref.dtype)                        # (TB, C) native width

    # ---- decoder: Linear -> Tanh -> Linear -> Tanh ----
    h2 = jnp.tanh(jnp.dot(z.astype(jnp.bfloat16), w3_ref[...],
                          preferred_element_type=jnp.float32) + b3_ref[...])
    xt = jnp.tanh(jnp.dot(h2.astype(jnp.bfloat16), w4_ref[...],
                          preferred_element_type=jnp.float32) + b4_ref[...])
    xt_ref[...] = xt.astype(xt_ref.dtype)                     # (TB, D)


def prepare_params(params):
    """One-time preparation for the kernel: cast weights to bf16.

    Do this once at init / checkpoint-load time, NOT inside every forward
    call, so no per-call convert ops re-stream the weights through HBM.
    Biases stay f32 (added after the f32 MXU accumulation).
    """
    w1, b1, w2, b2, w3, b3, w4, b4 = params
    to_bf16 = lambda w: w.astype(jnp.bfloat16)
    return (to_bf16(w1), b1, to_bf16(w2), b2, to_bf16(w3), b3, to_bf16(w4), b4)


@functools.partial(jax.jit, static_argnames=("block_b",))
def autoencoder_forward(x_nchw, prepared_params, block_b=512):
    """Fused AutoEncoder forward.

    Returns (z, x_tilde) with x_tilde reshaped to x's shape (view_as
    semantics).  `prepared_params` must come from prepare_params().
    """
    B = x_nchw.shape[0]
    D = math.prod(x_nchw.shape[1:])
    x2d = x_nchw.reshape(B, D)                                # == x.view(B, -1)

    w1, b1, w2, b2, w3, b3, w4, b4 = prepared_params
    H = w1.shape[1]
    C = w2.shape[1]

    # Batch tile: default 512 (feeds the MXU plenty of rows, ~85% of HBM
    # roofline per measured tiled data), sublane-aligned to 8, shrunk to
    # cover tiny batches.
    TB = min(block_b, _round_up(B, 8))
    # Keep >= 2 grid steps whenever the batch allows: the "parallel" batch
    # axis can then shard across both v7x TensorCores and the auto-pipeline
    # overlaps the next tile's DMA with this tile's compute.
    if pl.cdiv(B, TB) < 2 and B > 8:
        TB = max(8, _round_up(pl.cdiv(B, 2), 8))
    grid = (pl.cdiv(B, TB),)

    x_spec = pl.BlockSpec((TB, D), lambda i: (i, 0))
    z_spec = pl.BlockSpec((TB, C), lambda i: (i, 0))          # native width, no pad
    xt_spec = pl.BlockSpec((TB, D), lambda i: (i, 0))

    def const_spec(shape):                                    # VMEM-resident params
        return pl.BlockSpec(shape, lambda i: (0, 0))

    # Advisory cost estimate for the XLA scheduler.
    flops = 2 * B * (D * H + H * C + C * H + H * D)
    transcendentals = B * (H + H + D)                         # three tanh layers
    bytes_accessed = (B * D * 4                               # x in (f32)
                      + B * C * 4 + B * D * 4                 # z, x_tilde out (f32)
                      + 2 * (D * H + H * C + C * H + H * D)   # bf16 weights
                      + 4 * (H + C + H + D))                  # f32 biases

    # VMEM budget: double-buffered x/xt/z tiles + double-buffered params,
    # plus slack; capped at 48 MiB for headroom under v7x's 64 MiB VMEM.
    vmem_needed = (2 * TB * D * 4 * 2                         # x, xt tiles (f32, 2 bufs)
                   + TB * C * 4 * 2                           # z tiles
                   + 2 * (D * H + H * C + C * H + H * D) * 2  # bf16 weights (2 bufs)
                   + 4 * (H + C + H + D) * 2)                 # f32 biases  (2 bufs)
    vmem_limit = int(min(max(vmem_needed + (8 << 20), 16 << 20), 48 << 20))

    z, xt = pl.pallas_call(
        _autoencoder_kernel,
        grid=grid,
        out_shape=(jax.ShapeDtypeStruct((B, C), jnp.float32),
                   jax.ShapeDtypeStruct((B, D), jnp.float32)),
        in_specs=[x_spec,
                  const_spec(w1.shape), const_spec(b1.shape),
                  const_spec(w2.shape), const_spec(b2.shape),
                  const_spec(w3.shape), const_spec(b3.shape),
                  const_spec(w4.shape), const_spec(b4.shape)],
        out_specs=(z_spec, xt_spec),
        compiler_params=pltpu.CompilerParams(
            dimension_semantics=("parallel",),                # megacore on v7x
            vmem_limit_bytes=vmem_limit),
        cost_estimate=pl.CostEstimate(flops=flops,
                                      transcendentals=transcendentals,
                                      bytes_accessed=bytes_accessed),
    )(x2d, w1, b1, w2, b2, w3, b3, w4, b4)

    return z, xt.reshape(x_nchw.shape)                        # view_as(x)


def init_params(key, d_in, hidden, n_concepts):
    """Deterministic Kaiming-uniform-ish init (matches nn.Linear shapes)."""
    ks = jax.random.split(key, 8)

    def lin(kw, kb, fan_in, fan_out):
        bound = 1.0 / jnp.sqrt(fan_in)
        w = jax.random.uniform(kw, (fan_in, fan_out), jnp.float32, -bound, bound)
        b = jax.random.uniform(kb, (1, fan_out), jnp.float32, -bound, bound)
        return w, b

    w1, b1 = lin(ks[0], ks[1], d_in, hidden)        # encoder layer 1
    w2, b2 = lin(ks[2], ks[3], hidden, n_concepts)  # encoder layer 2
    w3, b3 = lin(ks[4], ks[5], n_concepts, hidden)  # decoder layer 1
    w4, b4 = lin(ks[6], ks[7], hidden, d_in)        # decoder layer 2
    return (w1, b1, w2, b2, w3, b3, w4, b4)


def _reference_forward(x_nchw, params):
    """Pure-JAX f32 reference for a sanity check."""
    w1, b1, w2, b2, w3, b3, w4, b4 = params
    B = x_nchw.shape[0]
    x = x_nchw.reshape(B, -1)
    h = jnp.tanh(x @ w1 + b1)
    z = h @ w2 + b2
    h2 = jnp.tanh(z @ w3 + b3)
    xt = jnp.tanh(h2 @ w4 + b4)
    return z, xt.reshape(x_nchw.shape)


if __name__ == "__main__":
    key = jax.random.PRNGKey(0)
    kx, kp = jax.random.split(key)

    # Small image-like input: batch=2, channels=4, spatial=16x16 (NCHW)
    B, Cin, Hsp, Wsp = 2, 4, 16, 16
    D = Cin * Hsp * Wsp          # 1024 flattened features
    HIDDEN = 128
    NCONCEPTS = 32

    x = jax.random.normal(kx, (B, Cin, Hsp, Wsp), jnp.float32)
    params = init_params(kp, D, HIDDEN, NCONCEPTS)
    kparams = prepare_params(params)            # one-time bf16 cast of weights

    z, x_tilde = autoencoder_forward(x, kparams)
    jax.block_until_ready((z, x_tilde))

    # Correctness check against pure-JAX f32 reference (bf16 matmul inputs
    # with f32 accumulation -> slightly looser tolerances).
    z_ref, xt_ref = _reference_forward(x, params)
    assert z.shape == (B, NCONCEPTS)
    assert x_tilde.shape == x.shape
    assert jnp.allclose(z, z_ref, atol=3e-2, rtol=3e-2)
    assert jnp.allclose(x_tilde, xt_ref, atol=3e-2, rtol=3e-2)

    print("KERNEL_OK")
</pallas_src>

<mosaic_0001>
module attributes {stable_mosaic.version = 11 : i64} {
  func.func @_autoencoder_kernel(%arg0: i32, %arg1: memref<8x1024xf32, #tpu.memory_space<vmem>>, %arg2: memref<1024x128xbf16, #tpu.memory_space<vmem>>, %arg3: memref<1x128xf32, #tpu.memory_space<vmem>>, %arg4: memref<128x32xbf16, #tpu.memory_space<vmem>>, %arg5: memref<1x32xf32, #tpu.memory_space<vmem>>, %arg6: memref<32x128xbf16, #tpu.memory_space<vmem>>, %arg7: memref<1x128xf32, #tpu.memory_space<vmem>>, %arg8: memref<128x1024xbf16, #tpu.memory_space<vmem>>, %arg9: memref<1x1024xf32, #tpu.memory_space<vmem>>, %arg10: memref<8x32xf32, #tpu.memory_space<vmem>>, %arg11: memref<8x1024xf32, #tpu.memory_space<vmem>>) attributes {dimension_semantics = [#tpu.dimension_semantics<parallel>], iteration_bounds = array<i64: 1>, scalar_prefetch = 0 : i64, scratch_operands = 0 : i64, tpu.core_type = #tpu.core_type<tc>, window_params = [{transform_indices = @transform_0, window_bounds = array<i64: 8, 1024>}, {pipeline_mode = #tpu.pipeline_mode<synchronous>, transform_indices = @transform_1, window_bounds = array<i64: 1024, 128>}, {pipeline_mode = #tpu.pipeline_mode<synchronous>, transform_indices = @transform_2, window_bounds = array<i64: 1, 128>}, {pipeline_mode = #tpu.pipeline_mode<synchronous>, transform_indices = @transform_3, window_bounds = array<i64: 128, 32>}, {pipeline_mode = #tpu.pipeline_mode<synchronous>, transform_indices = @transform_4, window_bounds = array<i64: 1, 32>}, {pipeline_mode = #tpu.pipeline_mode<synchronous>, transform_indices = @transform_5, window_bounds = array<i64: 32, 128>}, {pipeline_mode = #tpu.pipeline_mode<synchronous>, transform_indices = @transform_6, window_bounds = array<i64: 1, 128>}, {pipeline_mode = #tpu.pipeline_mode<synchronous>, transform_indices = @transform_7, window_bounds = array<i64: 128, 1024>}, {pipeline_mode = #tpu.pipeline_mode<synchronous>, transform_indices = @transform_8, window_bounds = array<i64: 1, 1024>}, {transform_indices = @transform_9, window_bounds = array<i64: 8, 32>}, {transform_indices = @transform_10, window_bounds = array<i64: 8, 1024>}]} {
    %c0 = arith.constant 0 : index
    %c0_0 = arith.constant 0 : index
    %0 = vector.load %arg1[%c0, %c0_0] : memref<8x1024xf32, #tpu.memory_space<vmem>>, vector<8x1024xf32>
    %1 = arith.truncf %0 : vector<8x1024xf32> to vector<8x1024xbf16>
    %c0_1 = arith.constant 0 : index
    %c0_2 = arith.constant 0 : index
    %2 = vector.load %arg2[%c0_1, %c0_2] : memref<1024x128xbf16, #tpu.memory_space<vmem>>, vector<1024x128xbf16>
    %cst = arith.constant dense<0.000000e+00> : vector<8x128xf32>
    %3 = tpu.matmul %1, %2, %cst {dimension_numbers = #tpu.dot_dimension_numbers<[1], [0], [0], [1], [0, 0, 1, 1], [], []>} : vector<8x1024xbf16>, vector<1024x128xbf16>, vector<8x128xf32> -> vector<8x128xf32>
    %c0_3 = arith.constant 0 : index
    %c0_4 = arith.constant 0 : index
    %4 = vector.load %arg3[%c0_3, %c0_4] : memref<1x128xf32, #tpu.memory_space<vmem>>, vector<1x128xf32>
    %5 = vector.broadcast %4 : vector<1x128xf32> to vector<8x128xf32>
    %6 = arith.addf %3, %5 : vector<8x128xf32>
    %7 = math.tanh %6 : vector<8x128xf32>
    %8 = arith.truncf %7 : vector<8x128xf32> to vector<8x128xbf16>
    %c0_5 = arith.constant 0 : index
    %c0_6 = arith.constant 0 : index
    %9 = vector.load %arg4[%c0_5, %c0_6] : memref<128x32xbf16, #tpu.memory_space<vmem>>, vector<128x32xbf16>
    %cst_7 = arith.constant dense<0.000000e+00> : vector<8x32xf32>
    %10 = tpu.matmul %8, %9, %cst_7 {dimension_numbers = #tpu.dot_dimension_numbers<[1], [0], [0], [1], [0, 0, 1, 1], [], []>} : vector<8x128xbf16>, vector<128x32xbf16>, vector<8x32xf32> -> vector<8x32xf32>
    %c0_8 = arith.constant 0 : index
    %c0_9 = arith.constant 0 : index
    %11 = vector.load %arg5[%c0_8, %c0_9] : memref<1x32xf32, #tpu.memory_space<vmem>>, vector<1x32xf32>
    %12 = vector.broadcast %11 : vector<1x32xf32> to vector<8x32xf32>
    %13 = arith.addf %10, %12 : vector<8x32xf32>
    %c0_10 = arith.constant 0 : index
    %c0_11 = arith.constant 0 : index
    %14 = vector.load %arg10[%c0_10, %c0_11] : memref<8x32xf32, #tpu.memory_space<vmem>>, vector<8x32xf32>
    tpu.vector_store %arg10[%c0_10, %c0_11], %13 {strides = array<i32>} : memref<8x32xf32, #tpu.memory_space<vmem>>, vector<8x32xf32>,
    %15 = arith.truncf %13 : vector<8x32xf32> to vector<8x32xbf16>
    %c0_12 = arith.constant 0 : index
    %c0_13 = arith.constant 0 : index
    %16 = vector.load %arg6[%c0_12, %c0_13] : memref<32x128xbf16, #tpu.memory_space<vmem>>, vector<32x128xbf16>
    %cst_14 = arith.constant dense<0.000000e+00> : vector<8x128xf32>
    %17 = tpu.matmul %15, %16, %cst_14 {dimension_numbers = #tpu.dot_dimension_numbers<[1], [0], [0], [1], [0, 0, 1, 1], [], []>} : vector<8x32xbf16>, vector<32x128xbf16>, vector<8x128xf32> -> vector<8x128xf32>
    %c0_15 = arith.constant 0 : index
    %c0_16 = arith.constant 0 : index
    %18 = vector.load %arg7[%c0_15, %c0_16] : memref<1x128xf32, #tpu.memory_space<vmem>>, vector<1x128xf32>
    %19 = vector.broadcast %18 : vector<1x128xf32> to vector<8x128xf32>
    %20 = arith.addf %17, %19 : vector<8x128xf32>
    %21 = math.tanh %20 : vector<8x128xf32>
    %22 = arith.truncf %21 : vector<8x128xf32> to vector<8x128xbf16>
    %c0_17 = arith.constant 0 : index
    %c0_18 = arith.constant 0 : index
    %23 = vector.load %arg8[%c0_17, %c0_18] : memref<128x1024xbf16, #tpu.memory_space<vmem>>, vector<128x1024xbf16>
    %cst_19 = arith.constant dense<0.000000e+00> : vector<8x1024xf32>
    %24 = tpu.matmul %22, %23, %cst_19 {dimension_numbers = #tpu.dot_dimension_numbers<[1], [0], [0], [1], [0, 0, 1, 1], [], []>} : vector<8x128xbf16>, vector<128x1024xbf16>, vector<8x1024xf32> -> vector<8x1024xf32>
    %c0_20 = arith.constant 0 : index
    %c0_21 = arith.constant 0 : index
    %25 = vector.load %arg9[%c0_20, %c0_21] : memref<1x1024xf32, #tpu.memory_space<vmem>>, vector<1x1024xf32>
    %26 = vector.broadcast %25 : vector<1x1024xf32> to vector<8x1024xf32>
    %27 = arith.addf %24, %26 : vector<8x1024xf32>
    %28 = math.tanh %27 : vector<8x1024xf32>
    %c0_22 = arith.constant 0 : index
    %c0_23 = arith.constant 0 : index
    %29 = vector.load %arg11[%c0_22, %c0_23] : memref<8x1024xf32, #tpu.memory_space<vmem>>, vector<8x1024xf32>
    tpu.vector_store %arg11[%c0_22, %c0_23], %28 {strides = array<i32>} : memref<8x1024xf32, #tpu.memory_space<vmem>>, vector<8x1024xf32>,
    return
  }
  func.func @transform_0(%arg0: i32) -> (i32, i32) {
    %c0_i32 = arith.constant 0 : i32
    %c0_i32_0 = arith.constant 0 : i32
    return %arg0, %c0_i32 : i32, i32
  }
  func.func @transform_1(%arg0: i32) -> (i32, i32) {
    %c0_i32 = arith.constant 0 : i32
    %c0_i32_0 = arith.constant 0 : i32
    %c0_i32_1 = arith.constant 0 : i32
    return %c0_i32, %c0_i32_0 : i32, i32
  }
  func.func @transform_2(%arg0: i32) -> (i32, i32) {
    %c0_i32 = arith.constant 0 : i32
    %c0_i32_0 = arith.constant 0 : i32
    %c0_i32_1 = arith.constant 0 : i32
    return %c0_i32, %c0_i32_0 : i32, i32
  }
  func.func @transform_3(%arg0: i32) -> (i32, i32) {
    %c0_i32 = arith.constant 0 : i32
    %c0_i32_0 = arith.constant 0 : i32
    %c0_i32_1 = arith.constant 0 : i32
    return %c0_i32, %c0_i32_0 : i32, i32
  }
  func.func @transform_4(%arg0: i32) -> (i32, i32) {
    %c0_i32 = arith.constant 0 : i32
    %c0_i32_0 = arith.constant 0 : i32
    %c0_i32_1 = arith.constant 0 : i32
    return %c0_i32, %c0_i32_0 : i32, i32
  }
  func.func @transform_5(%arg0: i32) -> (i32, i32) {
    %c0_i32 = arith.constant 0 : i32
    %c0_i32_0 = arith.constant 0 : i32
    %c0_i32_1 = arith.constant 0 : i32
    return %c0_i32, %c0_i32_0 : i32, i32
  }
  func.func @transform_6(%arg0: i32) -> (i32, i32) {
    %c0_i32 = arith.constant 0 : i32
    %c0_i32_0 = arith.constant 0 : i32
    %c0_i32_1 = arith.constant 0 : i32
    return %c0_i32, %c0_i32_0 : i32, i32
  }
  func.func @transform_7(%arg0: i32) -> (i32, i32) {
    %c0_i32 = arith.constant 0 : i32
    %c0_i32_0 = arith.constant 0 : i32
    %c0_i32_1 = arith.constant 0 : i32
    return %c0_i32, %c0_i32_0 : i32, i32
  }
  func.func @transform_8(%arg0: i32) -> (i32, i32) {
    %c0_i32 = arith.constant 0 : i32
    %c0_i32_0 = arith.constant 0 : i32
    %c0_i32_1 = arith.constant 0 : i32
    return %c0_i32, %c0_i32_0 : i32, i32
  }
  func.func @transform_9(%arg0: i32) -> (i32, i32) {
    %c0_i32 = arith.constant 0 : i32
    %c0_i32_0 = arith.constant 0 : i32
    return %arg0, %c0_i32 : i32, i32
  }
  func.func @transform_10(%arg0: i32) -> (i32, i32) {
    %c0_i32 = arith.constant 0 : i32
    %c0_i32_0 = arith.constant 0 : i32
    return %arg0, %c0_i32 : i32, i32
  }
}

</mosaic_0001>

<bundles_post_ra>
// kernel: autoencoder_forward.1
= control target key start
LH: loop header
LB: loop body
LE: loop exit
PB: predicated region body
PF: predicated region fallthrough
CT: control target
= control target key end

     0   :  { %16 = vsyncpa [#allocation3], 0  ;;  %s2439_s0 = inlined_call_operand.vmem [shape: f32[2,1024], index: 0, kind: input, shape index: {}]   ;;  %s2440_s1 = inlined_call_operand.hbm [shape: bf16[1024,128], index: 1, kind: input, shape index: {}]   ;;  %s2441_s2 = inlined_call_operand.vmem [shape: f32[1,128], index: 2, kind: input, shape index: {}]   ;;  %s2442_s3 = inlined_call_operand.vmem [shape: bf16[128,32], index: 3, kind: input, shape index: {}]   ;;  %s2443_s4 = inlined_call_operand.vmem [shape: f32[1,32], index: 4, kind: input, shape index: {}]   ;;  %s2444_s5 = inlined_call_operand.vmem [shape: bf16[32,128], index: 5, kind: input, shape index: {}]   ;;  %s2445_s6 = inlined_call_operand.vmem [shape: f32[1,128], index: 6, kind: input, shape index: {}]   ;;  %s2446_s7 = inlined_call_operand.hbm [shape: bf16[128,1024], index: 7, kind: input, shape index: {}]   ;;  %s2447_s8 = inlined_call_operand.vmem [shape: f32[1,1024], index: 8, kind: input, shape index: {}]   ;;  %s2448_s9 = inlined_call_operand.hbm [shape: f32[2,32], index: 9, kind: output, shape index: {0}]   ;;  %s2449_s10 = inlined_call_operand.vmem [shape: f32[2,1024], index: 10, kind: output, shape index: {1}]  }
   0x1   :  { %17 = vsyncpa [#allocation6], 0 }
   0x2   :  { %18 = vsyncpa [#allocation4], 0  ;;  %s2230_s13 = smov [#allocation2]   ;;  %s2158_s17 = scalar_lea.hbm %s2440_s1, 8192 }
   0x3   :  { %s26_s14 = sshll.u32 %s2230_s13, 4  ;;  %p2159_p0 = scmp.ne.s32.totalorder %s2440_s1, %s2158_s17  ;;  %s27_s14 = int_to_ptr.vmem [resolvable:$true] %s26_s14 }
   0x4   :  { %p2162_p1 = scmp.lt.u32.totalorder %s2158_s17, %s2440_s1 }
   0x6   :  { %p2164_p2 = pnand %p2162_p1, %p2159_p0 }
   0x8   :  { %2167 = shalt.err (!%p2164_p2)
}
   0x9   :  { %s2168_s22 = scalar_lea.vmem %s27_s14, 8192  ;;  %p2173_p4 = scmp.lt.s32.totalorder %s27_s14, %s27_s14 }
   0xa   :  { %p2169_p3 = scmp.ne.s32.totalorder %s27_s14, %s2168_s22  ;;  %p2174_p5 = scmp.lt.s32.totalorder %s2168_s22, %s2168_s22 }
   0xc   :  { %p2175_p6 = por %p2174_p5, %p2173_p4 }
   0xe   :  { %p2176_p7 = pnand %p2175_p6, %p2169_p3 }
  0x10   :  { %2179 = shalt.err (!%p2176_p7)
}
  0x11   :  { %s2231_s23 = smov 64   ;;  %s2232_s24 = smov 4  }
  0x12   :  { %32 = dma.hbm_to_vmem [thread:$0]  %s2440_s1, 8192, %s27_s14, [#allocation3], %s2231_s23, %s2231_s23, %s2232_s24  }
  0x13   :  { %s2233_s27 = smov [#allocation5]   ;;  %s2180_s11 = scalar_lea.hbm %s2446_s7, 8192 }
  0x14   :  { %s48_s28 = sshll.u32 %s2233_s27, 4  ;;  %p2181_p8 = scmp.ne.s32.totalorder %s2446_s7, %s2180_s11  ;;  %s49_s28 = int_to_ptr.vmem [resolvable:$true] %s48_s28 }
  0x15   :  { %p2184_p9 = scmp.lt.u32.totalorder %s2180_s11, %s2446_s7 }
  0x17   :  { %p2186_p10 = pnand %p2184_p9, %p2181_p8 }
  0x19   :  { %2189 = shalt.err (!%p2186_p10)
}
  0x1a   :  { %s2190_s17 = scalar_lea.vmem %s49_s28, 8192  ;;  %p2195_p12 = scmp.lt.s32.totalorder %s49_s28, %s49_s28 }
  0x1b   :  { %p2191_p11 = scmp.ne.s32.totalorder %s49_s28, %s2190_s17  ;;  %p2196_p13 = scmp.lt.s32.totalorder %s2190_s17, %s2190_s17 }
  0x1d   :  { %p2197_p0 = por %p2196_p13, %p2195_p12 }
  0x1f   :  { %p2198_p1 = pnand %p2197_p0, %p2191_p11 }
  0x21   :  { %2201 = shalt.err (!%p2198_p1)
}
  0x22   :  { %s2234_s1 = smov 512   ;;  %s2235_s14 = smov 32  }
  0x23   :  { %54 = dma.hbm_to_vmem [thread:$0]  %s2446_s7, 8192, %s49_s28, [#allocation6], %s2234_s1, %s2234_s1, %s2235_s14  }
  0x24   :  { %2224 = dma.done.wait [#allocation3], 8192  }
  0x25   :  { %2225 = vsyncadd [#allocation3], 4294959104 }
  0x26   :  { %2226 = dma.done.wait [#allocation6], 8192  }
  0x27   :  { %2227 = vsyncadd [#allocation6], 4294959104  ;;  %v2052_v0 = vld [vmem:[#allocation2 + $0x40] sm:$0xff]   ;;  %v2056_v4 = vld [vmem:[#allocation2 + $0x48] sm:$0xff]   ;;  %v2236_v24 = vmov 1983009808   ;;  %v87_v26 = vlaneseq }
  0x28   :  { %v2053_v1 = vld [vmem:[#allocation2 + $0xc0] sm:$0xff]   ;;  %1912 = vmatprep.subr.bf16.mxu0 %v2052_v0  ;;  %v2057_v5 = vld [vmem:[#allocation2 + $0xc8] sm:$0xff]   ;;  %v2060_v8 = vld [vmem:[#allocation2 + $0x50] sm:$0xff]   ;;  %v85_v25 = vunpack.c.l.s4 %v2236_v24  ;;  %vm2238_vm0 = vmmov 0   ;;  %vm960_vm1 = vcmask 261120  }
  0x29   :  { %v2054_v2 = vld [vmem:[#allocation2] sm:$0xff]   ;;  %1934 = vmatprep.subr.bf16.mxu1 %v2053_v1  ;;  %v2058_v6 = vld [vmem:[#allocation2 + $0x8] sm:$0xff]   ;;  %v2061_v9 = vld [vmem:[#allocation2 + $0xd0] sm:$0xff]   ;;  %v2322_v32 = vshrl.u32 %v87_v26, 7 }
  0x2a   :  { %v2055_v3 = vld [vmem:[#allocation2 + $0x80] sm:$0xff]   ;;  %1913 = vmatpush3.bf16.msra.mxu0 %v2054_v2  ;;  %v2059_v7 = vld [vmem:[#allocation2 + $0x88] sm:$0xff]   ;;  %v2062_v10 = vld [vmem:[#allocation2 + $0x10] sm:$0xff]   ;;  %v86_v31 = vunpack.c.0.s8 %v85_v25 }
  0x2b   :  { %1935 = vmatpush3.bf16.msra.mxu1 %v2055_v3  ;;  %1914 = vmatprep.subr.bf16.mxu0 %v2056_v4  ;;  %v2063_v11 = vld [vmem:[#allocation2 + $0x90] sm:$0xff]   ;;  %v2064_v12 = vld [vmem:[#allocation2 + $0x58] sm:$0xff]   ;;  %v2068_v16 = vld [vmem:[#allocation2 + $0x60] sm:$0xff]  }
  0x2c   :  { %1936 = vmatprep.subr.bf16.mxu1 %v2057_v5  ;;  %v2065_v13 = vld [vmem:[#allocation2 + $0xd8] sm:$0xff]   ;;  %v2069_v17 = vld [vmem:[#allocation2 + $0xe0] sm:$0xff]   ;;  %v2072_v20 = vld [vmem:[#allocation2 + $0x68] sm:$0xff]   ;;  %v2325_v37 = vsub.s32 %v86_v31, %v2322_v32 }
  0x2d   :  { %v2066_v14 = vld [vmem:[#allocation2 + $0x18] sm:$0xff]   ;;  %v2070_v18 = vld [vmem:[#allocation2 + $0x20] sm:$0xff]   ;;  %v2073_v21 = vld [vmem:[#allocation2 + $0xe8] sm:$0xff]  }
  0x2e   :  { %1915 = vmatpush3.bf16.msra.mxu0 %v2058_v6  ;;  %v2067_v15 = vld [vmem:[#allocation2 + $0x98] sm:$0xff]   ;;  %v2071_v19 = vld [vmem:[#allocation2 + $0xa0] sm:$0xff]   ;;  %v2074_v22 = vld [vmem:[#allocation2 + $0x28] sm:$0xff]  }
  0x2f   :  { %1937 = vmatpush3.bf16.msra.mxu1 %v2059_v7  ;;  %1916 = vmatprep.subr.bf16.mxu0 %v2060_v8  ;;  %v2075_v23 = vld [vmem:[#allocation2 + $0xa8] sm:$0xff]   ;;  %v2076_v27 = vld [vmem:[#allocation2 + $0x70] sm:$0xff]   ;;  %v2080_v33 = vld [vmem:[#allocation2 + $0x78] sm:$0xff]  }
  0x30   :  { %1938 = vmatprep.subr.bf16.mxu1 %v2061_v9  ;;  %v2077_v28 = vld [vmem:[#allocation2 + $0xf0] sm:$0xff]   ;;  %v2081_v34 = vld [vmem:[#allocation2 + $0xf8] sm:$0xff]   ;;  %v2090_v44 = vld [vmem:[#allocation2 + $0x140] sm:$0xff]  }
  0x31   :  { %v2078_v29 = vld [vmem:[#allocation2 + $0x30] sm:$0xff]   ;;  %v2082_v35 = vld [vmem:[#allocation2 + $0x38] sm:$0xff]   ;;  %v2091_v47 = vld [vmem:[#allocation2 + $0x1c0] sm:$0xff]  }
  0x32   :  { %1917 = vmatpush3.bf16.msra.mxu0 %v2062_v10  ;;  %v2079_v30 = vld [vmem:[#allocation2 + $0xb0] sm:$0xff]   ;;  %v2083_v36 = vld [vmem:[#allocation2 + $0xb8] sm:$0xff]   ;;  %v2092_v50 = vld [vmem:[#allocation2 + $0x100] sm:$0xff]  }
  0x33   :  { %1939 = vmatpush3.bf16.msra.mxu1 %v2063_v11  ;;  %1918 = vmatprep.subr.bf16.mxu0 %v2064_v12  ;;  %v2084_v38 = vld [vmem:[%s2439_s0] ss:$16 sps:$4 sm:$0xff]   ;;  %v2088_v40 = vld [vmem:[%s2439_s0 + $0x4] ss:$16 sps:$4 sm:$0xff]   ;;  %v2094_v56 = vld [vmem:[#allocation2 + $0x148] sm:$0xff]  }
  0x34   :  { %1940 = vmatprep.subr.bf16.mxu1 %v2065_v13  ;;  %v2086_v39 = vld [vmem:[%s2439_s0 + $0x20] ss:$16 sps:$4 sm:$0xff]   ;;  %v2089_v41 = vld [vmem:[%s2439_s0 + $0x24] ss:$16 sps:$4 sm:$0xff]   ;;  %v90_v42 = vrot.slane %v2084_v38, %v2325_v37  ;;  %v97_v45 = vrot.slane %v2088_v40, %v2325_v37  ;;  %v2095_v59 = vld [vmem:[#allocation2 + $0x1c8] sm:$0xff]  }
  0x35   :  { %v104_v43 = vrot.slane %v2086_v39, %v2325_v37  ;;  %v111_v46 = vrot.slane %v2089_v41, %v2325_v37  ;;  %v2093_v53 = vld [vmem:[#allocation2 + $0x180] sm:$0xff]   ;;  %v2096_v60 = vld [vmem:[#allocation2 + $0x108] sm:$0xff]   ;;  %v2098_v62 = vld [vmem:[#allocation2 + $0x150] sm:$0xff]   ;;  %v2237_v41 = vmov 0.0  }
  0x36   :  { %1919 = vmatpush3.bf16.msra.mxu0 %v2066_v14  ;;  %v2097_v61 = vld [vmem:[#allocation2 + $0x188] sm:$0xff]   ;;  %v2099_v63 = vld [vmem:[#allocation2 + $0x1d0] sm:$0xff]   ;;  %v2102_v2 = vld [vmem:[#allocation2 + $0x158] sm:$0xff]  }
  0x37   :  { %1941 = vmatpush3.bf16.msra.mxu1 %v2067_v15  ;;  %1920 = vmatprep.subr.bf16.mxu0 %v2068_v16  ;;  %v113_v48 = vcombine.high %v90_v42, %v104_v43  ;;  %v112_v49 = vcombine.low %v90_v42, %v104_v43  ;;  %v115_v51 = vcombine.high %v97_v45, %v111_v46  ;;  %v2100_v0 = vld [vmem:[#allocation2 + $0x110] sm:$0xff]   ;;  %v2103_v3 = vld [vmem:[#allocation2 + $0x1d8] sm:$0xff]   ;;  %v2106_v6 = vld [vmem:[#allocation2 + $0x160] sm:$0xff]  }
  0x38   :  { %1942 = vmatprep.subr.bf16.mxu1 %v2069_v17  ;;  %v114_v52 = vcombine.low %v97_v45, %v111_v46  ;;  %v2101_v1 = vld [vmem:[#allocation2 + $0x190] sm:$0xff]   ;;  %v2104_v4 = vld [vmem:[#allocation2 + $0x118] sm:$0xff]   ;;  %v2107_v7 = vld [vmem:[#allocation2 + $0x1e0] sm:$0xff]  }
  0x39   :  { %v161_v54 = vpack.c.bf16 %v113_v48, %v113_v48  ;;  %v160_v55 = vpack.c.bf16 %v112_v49, %v112_v49  ;;  %v163_v57 = vpack.c.bf16 %v115_v51, %v115_v51  ;;  %v2105_v5 = vld [vmem:[#allocation2 + $0x198] sm:$0xff]   ;;  %v2108_v8 = vld [vmem:[#allocation2 + $0x120] sm:$0xff]   ;;  %v2110_v10 = vld [vmem:[#allocation2 + $0x168] sm:$0xff]  }
  0x3a   :  { %1921 = vmatpush3.bf16.msra.mxu0 %v2070_v18  ;;  %v162_v58 = vpack.c.bf16 %v114_v52, %v114_v52  ;;  %v2109_v9 = vld [vmem:[#allocation2 + $0x1a0] sm:$0xff]   ;;  %v2111_v11 = vld [vmem:[#allocation2 + $0x1e8] sm:$0xff]   ;;  %v2114_v14 = vld [vmem:[#allocation2 + $0x170] sm:$0xff]  }
  0x3b   :  { %1943 = vmatpush3.bf16.msra.mxu1 %v2071_v19  ;;  %1922 = vmatprep.subr.bf16.mxu0 %v2072_v20  ;;  %v2112_v12 = vld [vmem:[#allocation2 + $0x128] sm:$0xff]   ;;  %v2115_v15 = vld [vmem:[#allocation2 + $0x1f0] sm:$0xff]   ;;  %v2118_v18 = vld [vmem:[#allocation2 + $0x178] sm:$0xff]  }
  0x3c   :  { %1944 = vmatprep.subr.bf16.mxu1 %v2073_v21  ;;  %719 = vmatprep.mubr.bf16.mxu0 %v161_v54  ;;  %v2113_v13 = vld [vmem:[#allocation2 + $0x1a8] sm:$0xff]   ;;  %v2116_v16 = vld [vmem:[#allocation2 + $0x130] sm:$0xff]   ;;  %v2119_v19 = vld [vmem:[#allocation2 + $0x1f8] sm:$0xff]  }
  0x3d   :  { %759 = vmatprep.mubr.bf16.mxu1 %v163_v57  ;;  %v2117_v17 = vld [vmem:[#allocation2 + $0x1b0] sm:$0xff]   ;;  %v2120_v20 = vld [vmem:[#allocation2 + $0x138] sm:$0xff]   ;;  %v2128_v40 = vld [vmem:[%s2442_s3] sm:$0xff]  }
  0x3e   :  { %1923 = vmatpush3.bf16.msra.mxu0 %v2074_v22  ;;  %v2121_v21 = vld [vmem:[#allocation2 + $0x1b8] sm:$0xff]   ;;  %v2129_v42 = vld [vmem:[%s2442_s3 + $0x8] sm:$0xff]   ;;  %v2130_v43 = vld [vmem:[%s2442_s3 + $0x10] sm:$0xff]  }
  0x3f   :  { %1945 = vmatpush3.bf16.msra.mxu1 %v2075_v23  ;;  %1924 = vmatprep.subr.bf16.mxu0 %v2076_v27  ;;  %v2122_v22 = vld [vmem:[%s2439_s0 + $0x8] ss:$16 sps:$4 sm:$0xff]   ;;  %v2126_v24 = vld [vmem:[%s2439_s0 + $0xc] ss:$16 sps:$4 sm:$0xff]   ;;  %v2132_v45 = vld [vmem:[%s2442_s3 + $0x20] sm:$0xff]  }
  0x40   :  { %1946 = vmatprep.subr.bf16.mxu1 %v2077_v28  ;;  %v2124_v23 = vld [vmem:[%s2439_s0 + $0x28] ss:$16 sps:$4 sm:$0xff]   ;;  %v2127_v25 = vld [vmem:[%s2439_s0 + $0x2c] ss:$16 sps:$4 sm:$0xff]   ;;  %v126_v26 = vrot.slane %v2122_v22, %v2325_v37  ;;  %v133_v28 = vrot.slane %v2126_v24, %v2325_v37  ;;  %v2136_v49 = vld [vmem:[%s2444_s5] sm:$0xff]  }
  0x41   :  { %v140_v27 = vrot.slane %v2124_v23, %v2325_v37  ;;  %v2133_v46 = vld [vmem:[%s2442_s3 + $0x28] sm:$0xff]   ;;  %v2135_v48 = vld [vmem:[%s2442_s3 + $0x38] sm:$0xff]   ;;  %v1770_v52 = vld [vmem:[%s2441_s2] ss:$0 sm:$0xff] }
  0x42   :  { %1925 = vmatpush3.bf16.msra.mxu0 %v2078_v29  ;;  %v147_v29 = vrot.slane %v2127_v25, %v2325_v37  ;;  %v1040_v22 = vld [vmem:[#allocation5 + $0x48] sm:$0xff] }
  0x43   :  { %1947 = vmatpush3.bf16.msra.mxu1 %v2079_v30  ;;  %1926 = vmatprep.subr.bf16.mxu0 %v2080_v33  ;;  %v149_v30 = vcombine.high %v126_v26, %v140_v27  ;;  %v148_v31 = vcombine.low %v126_v26, %v140_v27  ;;  %v1044_v23 = vld [vmem:[#allocation5 + $0x68] sm:$0xff] }
  0x44   :  { %1948 = vmatprep.subr.bf16.mxu1 %v2081_v34  ;;  %v151_v33 = vcombine.high %v133_v28, %v147_v29  ;;  %v150_v34 = vcombine.low %v133_v28, %v147_v29  ;;  %v1859_v24 = vcombine.high %v1040_v22, %v1044_v23  ;;  %v1858_v25 = vcombine.low %v1040_v22, %v1044_v23  ;;  %v1048_v26 = vld [vmem:[#allocation5 + $0x88] sm:$0xff]  ;;  %v1033_v23 = vld [vmem:[#allocation5 + $0x10] sm:$0xff] }
  0x45   :  { %v1052_v27 = vld [vmem:[#allocation5 + $0xa8] sm:$0xff] }
  0x46   :  { %1927 = vmatpush3.bf16.msra.mxu0 %v2082_v35  ;;  %v165_v35 = vpack.c.bf16 %v149_v30, %v149_v30  ;;  %v167_v38 = vpack.c.bf16 %v151_v33, %v151_v33  ;;  %v166_v39 = vpack.c.bf16 %v150_v34, %v150_v34  ;;  %v1867_v28 = vcombine.high %v1048_v26, %v1052_v27  ;;  %v1056_v30 = vld [vmem:[#allocation5 + $0xc8] sm:$0xff] }
  0x47   :  { %1949 = vmatpush3.bf16.msra.mxu1 %v2083_v36  ;;  %1956 = vmatprep.subr.bf16.mxu0 %v2090_v44  ;;  %v164_v36 = vpack.c.bf16 %v148_v31, %v148_v31  ;;  %v2131_v44 = vld [vmem:[%s2442_s3 + $0x18] sm:$0xff]   ;;  %v1866_v29 = vcombine.low %v1048_v26, %v1052_v27  ;;  %v1060_v31 = vld [vmem:[#allocation5 + $0xe8] sm:$0xff] }
  0x48   :  { %1978 = vmatprep.subr.bf16.mxu1 %v2091_v47  ;;  %v2134_v47 = vld [vmem:[%s2442_s3 + $0x30] sm:$0xff]   ;;  %v1875_v33 = vcombine.high %v1056_v30, %v1060_v31  ;;  %v1874_v34 = vcombine.low %v1056_v30, %v1060_v31 }
  0x49   :  { %720 = vmatmul.mubr.bf16.vlgmr.msra.gmra.mrb[0].mxu0 %v160_v55 }
  0x4a   :  { %760 = vmatmul.mubr.bf16.vlgmr.msra.gmra.mrb[0].mxu1 %v162_v58  ;;  %1957 = vmatpush3.bf16.msra.mxu0 %v2092_v50 }
  0x4b   :  { %1979 = vmatpush3.bf16.msra.mxu1 %v2093_v53  ;;  %1958 = vmatprep.subr.bf16.mxu0 %v2094_v56 }
  0x4c   :  { %1980 = vmatprep.subr.bf16.mxu1 %v2095_v59  ;;  %799 = vmatprep.mubr.bf16.mxu0 %v165_v35  ;;  %v1064_v35 = vld [vmem:[#allocation5 + $0x108] sm:$0xff] }
  0x4d   :  { %839 = vmatprep.mubr.bf16.mxu1 %v167_v38 }
  0x4e   :  { %1959 = vmatpush3.bf16.msra.mxu0 %v2096_v60 }
  0x4f   :  { %1981 = vmatpush3.bf16.msra.mxu1 %v2097_v61  ;;  %1960 = vmatprep.subr.bf16.mxu0 %v2098_v62 }
  0x50   :  { %1982 = vmatprep.subr.bf16.mxu1 %v2099_v63 }
  0x52   :  { %1961 = vmatpush3.bf16.msra.mxu0 %v2100_v0 }
  0x53   :  { %1983 = vmatpush3.bf16.msra.mxu1 %v2101_v1  ;;  %1962 = vmatprep.subr.bf16.mxu0 %v2102_v2 }
  0x54   :  { %1984 = vmatprep.subr.bf16.mxu1 %v2103_v3 }
  0x56   :  { %1963 = vmatpush3.bf16.msra.mxu0 %v2104_v4 }
  0x57   :  { %1985 = vmatpush3.bf16.msra.mxu1 %v2105_v5  ;;  %1964 = vmatprep.subr.bf16.mxu0 %v2106_v6 }
  0x58   :  { %1986 = vmatprep.subr.bf16.mxu1 %v2107_v7 }
  0x5a   :  { %1965 = vmatpush3.bf16.msra.mxu0 %v2108_v8 }
  0x5b   :  { %1987 = vmatpush3.bf16.msra.mxu1 %v2109_v9  ;;  %1966 = vmatprep.subr.bf16.mxu0 %v2110_v10 }
  0x5c   :  { %1988 = vmatprep.subr.bf16.mxu1 %v2111_v11 }
  0x5e   :  { %1967 = vmatpush3.bf16.msra.mxu0 %v2112_v12 }
  0x5f   :  { %1989 = vmatpush3.bf16.msra.mxu1 %v2113_v13  ;;  %1968 = vmatprep.subr.bf16.mxu0 %v2114_v14  ;;  %v2137_v13 = vld [vmem:[%s2444_s5 + $0x8] sm:$0xff]   ;;  %v1031_v14 = vld [vmem:[#allocation5] sm:$0xff] }
  0x60   :  { %1990 = vmatprep.subr.bf16.mxu1 %v2115_v15  ;;  %v1035_v15 = vld [vmem:[#allocation5 + $0x20] sm:$0xff] }
  0x62   :  { %1969 = vmatpush3.bf16.msra.mxu0 %v2116_v16  ;;  %v1032_v16 = vld [vmem:[#allocation5 + $0x8] sm:$0xff] }
  0x63   :  { %1991 = vmatpush3.bf16.msra.mxu1 %v2117_v17  ;;  %1970 = vmatprep.subr.bf16.mxu0 %v2118_v18  ;;  %v1848_v17 = vcombine.low %v1031_v14, %v1035_v15  ;;  %v1849_v18 = vcombine.high %v1031_v14, %v1035_v15  ;;  %v1087_v15 = vld [vmem:[#allocation5 + $0x1c0] sm:$0xff] }
  0x64   :  { %1992 = vmatprep.subr.bf16.mxu1 %v2119_v19  ;;  %v1036_v19 = vld [vmem:[#allocation5 + $0x28] sm:$0xff] }
  0x66   :  { %1971 = vmatpush3.bf16.msra.mxu0 %v2120_v20  ;;  %v1850_v20 = vcombine.low %v1032_v16, %v1036_v19 }
  0x67   :  { %1993 = vmatpush3.bf16.msra.mxu1 %v2121_v21  ;;  %2012 = vmatprep.subr.bf16.mxu0 %v2237_v41  ;;  %v1851_v21 = vcombine.high %v1032_v16, %v1036_v19  ;;  %v1091_v16 = vld [vmem:[#allocation5 + $0x1e0] sm:$0xff]  ;;  %v1092_v19 = vld [vmem:[#allocation5 + $0x1e8] sm:$0xff] }
  0x68   :  { %2032 = vmatprep.subr.bf16.mxu1 %v2237_v41 }
  0x69   :  { %800 = vmatmul.mubr.bf16.vlgmr.msra.gmra.mrb[4].mxu0 %v164_v36  ;;  %v1068_v36 = vld [vmem:[#allocation5 + $0x128] sm:$0xff] }
  0x6a   :  { %840 = vmatmul.mubr.bf16.vlgmr.msra.gmra.mrb[4].mxu1 %v166_v39  ;;  %2013 = vmatpush3.bf16.msra.mxu0 %v2128_v40  ;;  %v1883_v38 = vcombine.high %v1064_v35, %v1068_v36  ;;  %v1882_v39 = vcombine.low %v1064_v35, %v1068_v36  ;;  %v1835_v40 = vld [vmem:[%s2443_s4] ss:$0 sm:$0xff] }
  0x6b   :  { %2014 = vmatprep.subr.bf16.mxu0 %v2237_v41  ;;  %2028 = vmatprep.mubr.msk.bf16.mxu0 %vm2238_vm0, %v2237_v41 }
  0x6c   :  { %2036 = vmatprep.mubr.msk.bf16.mxu1 %vm2238_vm0, %v2237_v41  ;;  %2033 = vmatpush3.bf16.msra.mxu1 %v2136_v49 }
  0x6d   :  { %2034 = vmatprep.subr.bf16.mxu1 %v2237_v41 }
  0x6e   :  { %2015 = vmatpush3.bf16.msra.mxu0 %v2129_v42  ;;  %v1039_v42 = vld [vmem:[#allocation5 + $0x40] sm:$0xff] }
  0x6f   :  { %2016 = vmatprep.subr.bf16.mxu0 %v2237_v41 }
  0x70   :  { %2035 = vmatpush3.bf16.msra.mxu1 %v2137_v13 }
  0x71   :  { %1457 = vmatprep.subr.bf16.mxu1 %v1849_v18  ;;  %v1905_v18 = vcombine.high %v1087_v15, %v1091_v16 }
  0x72   :  { %2017 = vmatpush3.bf16.msra.mxu0 %v2130_v43  ;;  %v1043_v43 = vld [vmem:[#allocation5 + $0x60] sm:$0xff] }
  0x73   :  { %2018 = vmatprep.subr.bf16.mxu0 %v2237_v41  ;;  %v1857_v49 = vcombine.high %v1039_v42, %v1043_v43 }
  0x76   :  { %2019 = vmatpush3.bf16.msra.mxu0 %v2131_v44 }
  0x77   :  { %2020 = vmatprep.subr.bf16.mxu0 %v2237_v41 }
  0x7a   :  { %2021 = vmatpush3.bf16.msra.mxu0 %v2132_v45 }
  0x7b   :  { %2022 = vmatprep.subr.bf16.mxu0 %v2237_v41 }
  0x7e   :  { %2023 = vmatpush3.bf16.msra.mxu0 %v2133_v46 }
  0x7f   :  { %2024 = vmatprep.subr.bf16.mxu0 %v2237_v41 }
  0x82   :  { %2025 = vmatpush3.bf16.msra.mxu0 %v2134_v47 }
  0x83   :  { %2026 = vmatprep.subr.bf16.mxu0 %v2237_v41 }
  0x86   :  { %2027 = vmatpush3.bf16.msra.mxu0 %v2135_v48 }
  0x87   :  { %1498 = vmatprep.subr.bf16.mxu0 %v1851_v21 }
 0x11c   :  { %v1928_v50 = vpop.f32.mrb[0].mxu0 }
 0x11d   :  { %v1950_v51 = vpop.f32.mrb[0].mxu1  ;;  %v1929_v53 = vpop.f32.mrb[1].mxu0 }
 0x11e   :  { %v1930_v54 = vadd.f32 %v1929_v53, %v1928_v50  ;;  %v1951_v55 = vpop.f32.mrb[1].mxu1  ;;  %v1931_v56 = vpop.f32.mrb[2].mxu0  ;;  %v1047_v50 = vld [vmem:[#allocation5 + $0x80] sm:$0xff] }
 0x11f   :  { %v1952_v57 = vadd.f32 %v1951_v55, %v1950_v51  ;;  %v1953_v58 = vpop.f32.mrb[2].mxu1  ;;  %v1932_v59 = vpop.f32.mrb[3].mxu0  ;;  %v1051_v51 = vld [vmem:[#allocation5 + $0xa0] sm:$0xff] }
 0x120   :  { %v722_v60 = vadd.f32 %v1930_v54, %v1770_v52  ;;  %v1954_v61 = vpop.f32.mrb[3].mxu1  ;;  %v1856_v52 = vcombine.low %v1039_v42, %v1043_v43  ;;  %v1865_v53 = vcombine.high %v1047_v50, %v1051_v51  ;;  %v1055_v54 = vld [vmem:[#allocation5 + $0xc0] sm:$0xff]  ;;  %v1864_v56 = vcombine.low %v1047_v50, %v1051_v51  ;;  %v1042_v42 = vld [vmem:[#allocation5 + $0x58] sm:$0xff] }
 0x121   :  { %v1059_v55 = vld [vmem:[#allocation5 + $0xe0] sm:$0xff]  ;;  %v1046_v43 = vld [vmem:[#allocation5 + $0x78] sm:$0xff] }
 0x122   :  { %v762_v62 = vadd.f32 %v1952_v57, %v722_v60  ;;  %v1873_v57 = vcombine.high %v1055_v54, %v1059_v55  ;;  %v1063_v58 = vld [vmem:[#allocation5 + $0x100] sm:$0xff]  ;;  %v1872_v60 = vcombine.low %v1055_v54, %v1059_v55  ;;  %v1050_v50 = vld [vmem:[#allocation5 + $0x98] sm:$0xff] }
 0x123   :  { %v1067_v59 = vld [vmem:[#allocation5 + $0x120] sm:$0xff]  ;;  %v1054_v51 = vld [vmem:[#allocation5 + $0xb8] sm:$0xff] }
 0x124   :  { %v1881_v61 = vcombine.high %v1063_v58, %v1067_v59  ;;  %v1871_v55 = vcombine.high %v1050_v50, %v1054_v51 }
 0x13c   :  { %v1972_v63 = vpop.f32.mrb[4].mxu0 }
 0x13d   :  { %v1994_v0 = vpop.f32.mrb[4].mxu1  ;;  %v1973_v1 = vpop.f32.mrb[5].mxu0 }
 0x13e   :  { %v1974_v2 = vadd.f32 %v1973_v1, %v1972_v63  ;;  %v1995_v3 = vpop.f32.mrb[5].mxu1  ;;  %v1975_v4 = vpop.f32.mrb[6].mxu0  ;;  %v1071_v63 = vld [vmem:[#allocation5 + $0x140] sm:$0xff]  ;;  %v1072_v1 = vld [vmem:[#allocation5 + $0x148] sm:$0xff] }
 0x13f   :  { %v1996_v5 = vadd.f32 %v1995_v3, %v1994_v0  ;;  %v1997_v6 = vpop.f32.mrb[6].mxu1  ;;  %v1976_v7 = vpop.f32.mrb[7].mxu0  ;;  %v1075_v0 = vld [vmem:[#allocation5 + $0x160] sm:$0xff]  ;;  %v1076_v3 = vld [vmem:[#allocation5 + $0x168] sm:$0xff] }
 0x140   :  { %v802_v8 = vadd.f32 %v1974_v2, %v762_v62  ;;  %v1998_v9 = vpop.f32.mrb[7].mxu1  ;;  %v1880_v62 = vcombine.low %v1063_v58, %v1067_v59  ;;  %v1889_v2 = vcombine.high %v1071_v63, %v1075_v0  ;;  %v1888_v4 = vcombine.low %v1071_v63, %v1075_v0  ;;  %v1079_v7 = vld [vmem:[#allocation5 + $0x180] sm:$0xff]  ;;  %v1058_v58 = vld [vmem:[#allocation5 + $0xd8] sm:$0xff]  ;;  %v1065_v0 = vld [vmem:[#allocation5 + $0x110] sm:$0xff] }
 0x141   :  { %v1891_v6 = vcombine.high %v1072_v1, %v1076_v3  ;;  %v1080_v9 = vld [vmem:[#allocation5 + $0x188] sm:$0xff]  ;;  %v1062_v59 = vld [vmem:[#allocation5 + $0xf8] sm:$0xff] }
 0x142   :  { %v842_v10 = vadd.f32 %v1996_v5, %v802_v8  ;;  %v1890_v5 = vcombine.low %v1072_v1, %v1076_v3  ;;  %v1083_v8 = vld [vmem:[#allocation5 + $0x1a0] sm:$0xff]  ;;  %v1879_v63 = vcombine.high %v1058_v58, %v1062_v59  ;;  %v1069_v1 = vld [vmem:[#allocation5 + $0x130] sm:$0xff]  ;;  %v1070_v3 = vld [vmem:[#allocation5 + $0x138] sm:$0xff] }
 0x144   :  { %2138 = vtanh.f32 %v842_v10  ;;  %v1897_v10 = vcombine.high %v1079_v7, %v1083_v8 }
 0x14e   :  { %v2139_v11 = vpop.eup %2138 }
 0x14f   :  { %v848_v12 = vpack.c.bf16 %v2139_v11, %v2139_v11  ;;  %v1084_v11 = vld [vmem:[#allocation5 + $0x1a8] sm:$0xff] }
 0x150   :  { %v1898_v13 = vcombine.low %v1080_v9, %v1084_v11  ;;  %v1899_v14 = vcombine.high %v1080_v9, %v1084_v11  ;;  %v1077_v9 = vld [vmem:[#allocation5 + $0x170] sm:$0xff]  ;;  %v1078_v11 = vld [vmem:[#allocation5 + $0x178] sm:$0xff] }
 0x151   :  { %2029 = vmatmul.mubr.bf16.vlgmr.msra.gmra.mrb[8].mxu0 %v848_v12  ;;  %v1896_v12 = vcombine.low %v1079_v7, %v1083_v8  ;;  %v1073_v8 = vld [vmem:[#allocation5 + $0x150] sm:$0xff] }
 0x152   :  { %1499 = vmatpush1.bf16.msra.mxu0 %v1850_v20  ;;  %v1904_v20 = vcombine.low %v1087_v15, %v1091_v16  ;;  %v1081_v16 = vld [vmem:[#allocation5 + $0x190] sm:$0xff] }
 0x153   :  { %1500 = vmatprep.subr.bf16.mxu0 %v1859_v24  ;;  %v1037_v24 = vld [vmem:[#allocation5 + $0x30] sm:$0xff] }
 0x154   :  { %v1852_v26 = vcombine.low %v1033_v23, %v1037_v24  ;;  %v1853_v27 = vcombine.high %v1033_v23, %v1037_v24  ;;  %v1089_v24 = vld [vmem:[#allocation5 + $0x1d0] sm:$0xff] }
 0x156   :  { %1501 = vmatpush1.bf16.msra.mxu0 %v1858_v25  ;;  %v1034_v25 = vld [vmem:[#allocation5 + $0x18] sm:$0xff] }
 0x157   :  { %1502 = vmatprep.subr.bf16.mxu0 %v1867_v28  ;;  %v1038_v28 = vld [vmem:[#allocation5 + $0x38] sm:$0xff] }
 0x158   :  { %v1854_v30 = vcombine.low %v1034_v25, %v1038_v28  ;;  %v1855_v31 = vcombine.high %v1034_v25, %v1038_v28  ;;  %v1093_v25 = vld [vmem:[#allocation5 + $0x1f0] sm:$0xff] }
 0x15a   :  { %1503 = vmatpush1.bf16.msra.mxu0 %v1866_v29  ;;  %v2239_v29 = vmov 0  }
 0x15b   :  { %1504 = vmatprep.subr.bf16.mxu0 %v1875_v33  ;;  %1530 = vmatprep.mubr.bf16.mxu0 %v2239_v29  ;;  %v1844_v33 = vld [vmem:[%s2445_s6] ss:$0 sm:$0xff] }
 0x15e   :  { %1505 = vmatpush1.bf16.msra.mxu0 %v1874_v34 }
 0x15f   :  { %1506 = vmatprep.subr.bf16.mxu0 %v1883_v38 }
 0x162   :  { %1507 = vmatpush1.bf16.msra.mxu0 %v1882_v39 }
 0x163   :  { %1508 = vmatprep.subr.bf16.mxu0 %v1891_v6  ;;  %v1885_v6 = vcombine.high %v1065_v0, %v1069_v1 }
 0x166   :  { %1509 = vmatpush1.bf16.msra.mxu0 %v1890_v5  ;;  %v1878_v5 = vcombine.low %v1058_v58, %v1062_v59 }
 0x167   :  { %1510 = vmatprep.subr.bf16.mxu0 %v1899_v14  ;;  %v1893_v14 = vcombine.high %v1073_v8, %v1077_v9 }
 0x16a   :  { %1511 = vmatpush1.bf16.msra.mxu0 %v1898_v13 }
 0x224   :  { %v954_v41 = vpop.f32.mrb[8].mxu0 }
 0x225   :  { %v955_v44 = vadd.f32 %v1835_v40, %v954_v41  ;;  %v2030_v45 = vpop.f32.mrb[9].mxu0  ;;  %v1041_v40 = vld [vmem:[#allocation5 + $0x50] sm:$0xff] }
 0x226   :  { %v957_v46 = vpop.f32.mrb[10].mxu0  ;;  %v1045_v41 = vld [vmem:[#allocation5 + $0x70] sm:$0xff] }
 0x227   :  { %961 = vst.msk [vmem:[#allocation7] sm:$0xff] %vm960_vm1, %v955_v44  ;;  %v962_v47 = vpack.c.bf16 %v955_v44, %v955_v44  ;;  %v2031_v48 = vpop.f32.mrb[11].mxu0  ;;  %v1861_v46 = vcombine.high %v1041_v40, %v1045_v41 }
 0x228   :  { %v1049_v48 = vld [vmem:[#allocation5 + $0x90] sm:$0xff] }
 0x229   :  { %2037 = vmatmul.mubr.msk.bf16.vlgmr.msra.gmra.mrb[8].mxu1 %vm960_vm1, %v962_v47  ;;  %v1863_v47 = vcombine.high %v1042_v42, %v1046_v43 }
 0x22a   :  { %1458 = vmatpush1.bf16.msra.mxu1 %v1848_v17  ;;  %v1088_v17 = vld [vmem:[#allocation5 + $0x1c8] sm:$0xff]  ;;  %1489 = vmatprep.mubr.bf16.mxu1 %v2239_v29 }
 0x22b   :  { %1459 = vmatprep.subr.bf16.mxu1 %v1857_v49  ;;  %v1906_v21 = vcombine.low %v1088_v17, %v1092_v19  ;;  %v1907_v22 = vcombine.high %v1088_v17, %v1092_v19  ;;  %v1053_v49 = vld [vmem:[#allocation5 + $0xb0] sm:$0xff]  ;;  %v1086_v19 = vld [vmem:[#allocation5 + $0x1b8] sm:$0xff] }
 0x22c   :  { %v1869_v54 = vcombine.high %v1049_v48, %v1053_v49  ;;  %v1085_v17 = vld [vmem:[#allocation5 + $0x1b0] sm:$0xff] }
 0x22d   :  { %1512 = vmatprep.subr.bf16.mxu0 %v1907_v22  ;;  %v1901_v22 = vcombine.high %v1081_v16, %v1085_v17  ;;  %v1900_v28 = vcombine.low %v1081_v16, %v1085_v17 }
 0x22e   :  { %1460 = vmatpush1.bf16.msra.mxu1 %v1856_v52  ;;  %1513 = vmatpush1.bf16.msra.mxu0 %v1906_v21  ;;  %v1860_v52 = vcombine.low %v1041_v40, %v1045_v41  ;;  %v1111_v40 = vsub.s32 3, %v2322_v32 }
 0x22f   :  { %1461 = vmatprep.subr.bf16.mxu1 %v1865_v53  ;;  %1580 = vmatprep.subr.bf16.mxu0 %v1855_v31  ;;  %v1862_v53 = vcombine.low %v1042_v42, %v1046_v43 }
 0x232   :  { %1462 = vmatpush1.bf16.msra.mxu1 %v1864_v56  ;;  %v1057_v56 = vld [vmem:[#allocation5 + $0xd0] sm:$0xff] }
 0x233   :  { %1463 = vmatprep.subr.bf16.mxu1 %v1873_v57  ;;  %v1061_v57 = vld [vmem:[#allocation5 + $0xf0] sm:$0xff] }
 0x236   :  { %1464 = vmatpush1.bf16.msra.mxu1 %v1872_v60  ;;  %v1868_v60 = vcombine.low %v1049_v48, %v1053_v49 }
 0x237   :  { %1465 = vmatprep.subr.bf16.mxu1 %v1881_v61  ;;  %v1870_v61 = vcombine.low %v1050_v50, %v1054_v51 }
 0x23a   :  { %1466 = vmatpush1.bf16.msra.mxu1 %v1880_v62  ;;  %v1877_v62 = vcombine.high %v1057_v56, %v1061_v57 }
 0x23b   :  { %1467 = vmatprep.subr.bf16.mxu1 %v1889_v2  ;;  %v1066_v2 = vld [vmem:[#allocation5 + $0x118] sm:$0xff] }
 0x23c   :  { %v1887_v7 = vcombine.high %v1066_v2, %v1070_v3  ;;  %v1886_v13 = vcombine.low %v1066_v2, %v1070_v3  ;;  %v1115_v2 = vsub.s32 4, %v2322_v32  ;;  %v1123_v3 = vsub.s32 6, %v2322_v32 }
 0x23e   :  { %1468 = vmatpush1.bf16.msra.mxu1 %v1888_v4  ;;  %v1876_v4 = vcombine.low %v1057_v56, %v1061_v57 }
 0x23f   :  { %1469 = vmatprep.subr.bf16.mxu1 %v1897_v10  ;;  %v1074_v10 = vld [vmem:[#allocation5 + $0x158] sm:$0xff] }
 0x240   :  { %v1895_v15 = vcombine.high %v1074_v10, %v1078_v11  ;;  %v1894_v21 = vcombine.low %v1074_v10, %v1078_v11 }
 0x242   :  { %1470 = vmatpush1.bf16.msra.mxu1 %v1896_v12  ;;  %v1884_v12 = vcombine.low %v1065_v0, %v1069_v1 }
 0x243   :  { %1471 = vmatprep.subr.bf16.mxu1 %v1905_v18  ;;  %v1082_v18 = vld [vmem:[#allocation5 + $0x198] sm:$0xff] }
 0x244   :  { %v1903_v23 = vcombine.high %v1082_v18, %v1086_v19 }
 0x246   :  { %1472 = vmatpush1.bf16.msra.mxu1 %v1904_v20  ;;  %v1892_v20 = vcombine.low %v1073_v8, %v1077_v9 }
 0x247   :  { %1539 = vmatprep.subr.bf16.mxu1 %v1853_v27  ;;  %v1094_v27 = vld [vmem:[#allocation5 + $0x1f8] sm:$0xff] }
 0x2fc   :  { %v1023_v34 = vpop.f32.mrb[8].mxu1 }
 0x2fd   :  { %v1024_v35 = vadd.f32 %v1844_v33, %v1023_v34  ;;  %v2038_v36 = vpop.f32.mrb[9].mxu1  ;;  %v1908_v33 = vcombine.low %v1089_v24, %v1093_v25 }
 0x2fe   :  { %v1026_v38 = vpop.f32.mrb[10].mxu1  ;;  %v1107_v36 = vsub.s32 2, %v2322_v32 }
 0x2ff   :  { %2140 = vtanh.f32 %v1024_v35  ;;  %v2039_v39 = vpop.f32.mrb[11].mxu1  ;;  %v1099_v35 = vsub.s32 0, %v2322_v32  ;;  %v1095_v38 = vld [vmem:[%s2447_s8] sm:$0xff] }
 0x300   :  { %v1103_v39 = vsub.s32 1, %v2322_v32  ;;  %v1108_v42 = vrot.slane %v1095_v38, %v1107_v36 }
 0x301   :  { %v1100_v41 = vrot.slane %v1095_v38, %v1099_v35 }
 0x302   :  { %v1104_v43 = vrot.slane %v1095_v38, %v1103_v39 }
 0x309   :  { %v2141_v44 = vpop.eup %2140 }
 0x30a   :  { %v2398_v45 = vpack.c.bf16 %v2141_v44, %v2141_v44  ;;  %v1112_v44 = vrot.slane %v1095_v38, %v1111_v40 }
 0x30c   :  { %1490 = vmatmul.mubr.bf16.vlgmr.msra.gmra.mrb[12].mxu1 %v2398_v45  ;;  %1531 = vmatmul.mubr.bf16.vlgmr.msra.gmra.mrb[12].mxu0 %v2398_v45 }
 0x30d   :  { %1540 = vmatpush1.bf16.msra.mxu1 %v1852_v26  ;;  %1581 = vmatpush1.bf16.msra.mxu0 %v1854_v30  ;;  %v1090_v26 = vld [vmem:[#allocation5 + $0x1d8] sm:$0xff]  ;;  %v1909_v30 = vcombine.high %v1089_v24, %v1093_v25 }
 0x30e   :  { %1541 = vmatprep.subr.bf16.mxu1 %v1861_v46  ;;  %1582 = vmatprep.subr.bf16.mxu0 %v1863_v47  ;;  %v1911_v31 = vcombine.high %v1090_v26, %v1094_v27  ;;  %v1910_v34 = vcombine.low %v1090_v26, %v1094_v27 }
 0x30f   :  { %1571 = vmatprep.mubr.bf16.mxu1 %v2239_v29  ;;  %1612 = vmatprep.mubr.bf16.mxu0 %v2239_v29  ;;  %v1902_v29 = vcombine.low %v1082_v18, %v1086_v19 }
 0x311   :  { %1542 = vmatpush1.bf16.msra.mxu1 %v1860_v52  ;;  %1583 = vmatpush1.bf16.msra.mxu0 %v1862_v53 }
 0x312   :  { %1543 = vmatprep.subr.bf16.mxu1 %v1869_v54  ;;  %1584 = vmatprep.subr.bf16.mxu0 %v1871_v55 }
 0x315   :  { %1544 = vmatpush1.bf16.msra.mxu1 %v1868_v60  ;;  %1585 = vmatpush1.bf16.msra.mxu0 %v1870_v61 }
 0x316   :  { %1545 = vmatprep.subr.bf16.mxu1 %v1877_v62  ;;  %1586 = vmatprep.subr.bf16.mxu0 %v1879_v63 }
 0x319   :  { %1546 = vmatpush1.bf16.msra.mxu1 %v1876_v4  ;;  %1587 = vmatpush1.bf16.msra.mxu0 %v1878_v5  ;;  %v1119_v4 = vsub.s32 5, %v2322_v32  ;;  %v1127_v5 = vsub.s32 7, %v2322_v32 }
 0x31a   :  { %1547 = vmatprep.subr.bf16.mxu1 %v1885_v6  ;;  %1588 = vmatprep.subr.bf16.mxu0 %v1887_v7  ;;  %v1116_v6 = vrot.slane %v1095_v38, %v1115_v2  ;;  %v1124_v7 = vrot.slane %v1095_v38, %v1123_v3 }
 0x31b   :  { %v1120_v8 = vrot.slane %v1095_v38, %v1119_v4  ;;  %v1128_v9 = vrot.slane %v1095_v38, %v1127_v5 }
 0x31d   :  { %1548 = vmatpush1.bf16.msra.mxu1 %v1884_v12  ;;  %1589 = vmatpush1.bf16.msra.mxu0 %v1886_v13 }
 0x31e   :  { %1549 = vmatprep.subr.bf16.mxu1 %v1893_v14  ;;  %1590 = vmatprep.subr.bf16.mxu0 %v1895_v15 }
 0x321   :  { %1550 = vmatpush1.bf16.msra.mxu1 %v1892_v20  ;;  %1591 = vmatpush1.bf16.msra.mxu0 %v1894_v21 }
 0x322   :  { %1551 = vmatprep.subr.bf16.mxu1 %v1901_v22  ;;  %1592 = vmatprep.subr.bf16.mxu0 %v1903_v23 }
 0x325   :  { %1552 = vmatpush1.bf16.msra.mxu1 %v1900_v28  ;;  %1593 = vmatpush1.bf16.msra.mxu0 %v1902_v29 }
 0x326   :  { %1553 = vmatprep.subr.bf16.mxu1 %v1909_v30  ;;  %1594 = vmatprep.subr.bf16.mxu0 %v1911_v31 }
 0x329   :  { %1554 = vmatpush1.bf16.msra.mxu1 %v1908_v33  ;;  %1595 = vmatpush1.bf16.msra.mxu0 %v1910_v34 }
 0x32c   :  { %1572 = vmatmul.mubr.bf16.vlgmr.msra.gmra.mrb[16].mxu1 %v2398_v45  ;;  %1613 = vmatmul.mubr.bf16.vlgmr.msra.gmra.mrb[16].mxu0 %v2398_v45 }
 0x3df   :  { %v1491_v46 = vpop.f32.mrb[12].mxu1  ;;  %v1532_v47 = vpop.f32.mrb[12].mxu0 }
 0x3e0   :  { %v1492_v48 = vadd.f32 %v1491_v46, %v1100_v41  ;;  %v1533_v45 = vadd.f32 %v1532_v47, %v1108_v42  ;;  %v1493_v49 = vpop.f32.mrb[13].mxu1  ;;  %v1534_v50 = vpop.f32.mrb[13].mxu0 }
 0x3e1   :  { %v1494_v51 = vadd.f32 %v1493_v49, %v1104_v43  ;;  %v1535_v52 = vadd.f32 %v1534_v50, %v1112_v44  ;;  %v1495_v53 = vpop.f32.mrb[14].mxu1  ;;  %v1536_v54 = vpop.f32.mrb[14].mxu0 }
 0x3e2   :  { %2142 = vtanh.f32 %v1492_v48  ;;  %v1496_v55 = vpop.f32.mrb[15].mxu1  ;;  %v1537_v56 = vpop.f32.mrb[15].mxu0 }
 0x3e3   :  { %2144 = vtanh.f32 %v1533_v45 }
 0x3e4   :  { %2146 = vtanh.f32 %v1494_v51 }
 0x3e5   :  { %2148 = vtanh.f32 %v1535_v52 }
 0x3ec   :  { %v2143_v57 = vpop.eup %2142 }
 0x3ed   :  { %v2145_v58 = vpop.eup %2144 }
 0x3ee   :  { %v2147_v59 = vpop.eup %2146 }
 0x3ef   :  { %v2149_v60 = vpop.eup %2148  ;;  %v1637_v61 = vcombine.low %v2143_v57, %v2147_v59 }
 0x3f0   :  { %v1639_v62 = vcombine.low %v2145_v58, %v2149_v60 }
 0x3f1   :  { %v1647_v63 = vrot.slane %v1637_v61, %v2325_v37 }
 0x3f2   :  { %v1661_v0 = vrot.slane %v1639_v62, %v2325_v37 }
 0x3f4   :  { %v1669_v1 = vcombine.low %v1647_v63, %v1661_v0 }
 0x3ff   :  { %v1573_v10 = vpop.f32.mrb[16].mxu1  ;;  %v1614_v11 = vpop.f32.mrb[16].mxu0 }
 0x400   :  { %v1574_v12 = vadd.f32 %v1573_v10, %v1116_v6  ;;  %v1615_v13 = vadd.f32 %v1614_v11, %v1124_v7  ;;  %v1575_v14 = vpop.f32.mrb[17].mxu1  ;;  %v1616_v15 = vpop.f32.mrb[17].mxu0 }
 0x401   :  { %v1576_v16 = vadd.f32 %v1575_v14, %v1120_v8  ;;  %v1617_v17 = vadd.f32 %v1616_v15, %v1128_v9  ;;  %v1577_v18 = vpop.f32.mrb[18].mxu1  ;;  %v1618_v19 = vpop.f32.mrb[18].mxu0 }
 0x402   :  { %2150 = vtanh.f32 %v1574_v12  ;;  %v1578_v20 = vpop.f32.mrb[19].mxu1  ;;  %v1619_v21 = vpop.f32.mrb[19].mxu0 }
 0x403   :  { %2152 = vtanh.f32 %v1615_v13 }
 0x404   :  { %2154 = vtanh.f32 %v1576_v16 }
 0x405   :  { %2156 = vtanh.f32 %v1617_v17 }
 0x40c   :  { %v2151_v32 = vpop.eup %2150 }
 0x40d   :  { %v2153_v22 = vpop.eup %2152 }
 0x40e   :  { %v2155_v23 = vpop.eup %2154 }
 0x40f   :  { %v2157_v24 = vpop.eup %2156  ;;  %v1673_v25 = vcombine.low %v2151_v32, %v2155_v23 }
 0x410   :  { %v1675_v26 = vcombine.low %v2153_v22, %v2157_v24 }
 0x411   :  { %v1683_v27 = vrot.slane %v1673_v25, %v2325_v37 }
 0x412   :  { %v1697_v28 = vrot.slane %v1675_v26, %v2325_v37 }
 0x414   :  { %v1705_v29 = vcombine.low %v1683_v27, %v1697_v28 }
 0x415   :  { %1729 = vsyncadd [#allocation4], 96  ;;  %1752 = vst [vmem:[%s2449_s10] sm:$0xff] %v1669_v1  ;;  %s2240_s18 = smov [#allocation7]  }
 0x416   :  { %1754 = vst [vmem:[%s2449_s10 + $0x8] sm:$0xff] %v1705_v29  ;;  %s1730_s19 = sshll.u32 %s2240_s18, 4  ;;  %s1731_s19 = int_to_ptr.vmem [resolvable:$true] %s1730_s19 }
 0x417   :  { %s2202_s7 = scalar_lea.vmem %s1731_s19, 32  ;;  %s2206_s20 = scalar_lea.vmem %s1731_s19, 128 }
 0x418   :  { %p2203_p2 = scmp.ne.s32.totalorder %s1731_s19, %s2202_s7  ;;  %p2207_p3 = scmp.lt.s32.totalorder %s1731_s19, %s1731_s19 }
 0x419   :  { %p2208_p4 = scmp.lt.s32.totalorder %s2206_s20, %s2202_s7 }
 0x41b   :  { %p2209_p5 = por %p2208_p4, %p2207_p3 }
 0x41d   :  { %p2210_p6 = pnand %p2209_p5, %p2203_p2 }
 0x41f   :  { %2213 = shalt.err (!%p2210_p6)
}
 0x420   :  { %s2214_s23 = scalar_lea.hbm %s2448_s9, 32 }
 0x421   :  { %p2215_p7 = scmp.ne.s32.totalorder %s2448_s9, %s2214_s23  ;;  %p2218_p8 = scmp.lt.u32.totalorder %s2214_s23, %s2448_s9 }
 0x423   :  { %p2220_p9 = pnand %p2218_p8, %p2215_p7 }
 0x425   :  { %2223 = shalt.err (!%p2220_p9)
}
 0x426   :  { %s2241_s27 = smov 2  }
 0x427   :  { %1736 = dma.vmem_to_hbm [thread:$0]  %s1731_s19, 32, %s2448_s9, [#allocation4], %s2235_s14, %s2235_s14, %s2241_s27  }
 0x428   :  { %2228 = dma.done.wait [#allocation4], 128  }
 0x429   :  { %2229 = vsyncadd [#allocation4], 4294967168 }
 0x42a   :  { %1763 = vsyncpa [#allocation3], 1 }
 0x42b   :  { %1764 = vsyncpa [#allocation6], 1 }
 0x42c   :  { %1765 = vsyncpa [#allocation4], 1 }

</bundles_post_ra>
